<compile_context>
chip_gen: v7x
topology: tpu7x:2x2x1
jax: 0.10.0
libtpu: 0.0.40
codegen_flags: <defaults>
</compile_context>

<pallas_src>
import jax
import jax.numpy as jnp
from jax.experimental import pallas as pl
from jax.experimental.pallas import tpu as pltpu

# Module hyper-parameters (small, consistent with the PyTorch spec).
IMAGE_SHAPE = (1, 16, 16)
INPUT_DIM = IMAGE_SHAPE[0] * IMAGE_SHAPE[1] * IMAGE_SHAPE[2]   # 256 (flattened image)
NUM_CLASSES = 10
NC_PAD = 16                 # one-hot padded to 16 (extra cols hit zero weight rows)
HIDDEN_DIM = 32
HIDDEN_LAYERS = 2
BATCH = 8
BN_EPS = 1e-5
NEG_SLOPE = 0.2

# Parameter-table rows (all rows are HIDDEN_DIM wide, f32):
#   0                 : b_fc
#   1+3k, 2+3k, 3+3k  : b_k, bn_scale_k, bn_shift_k   for block k
#   PTAB_ROWS-2       : w_out  (as a row vector)
#   PTAB_ROWS-1       : [b_out, 0, 0, ...]
PTAB_ROWS = 1 + 3 * HIDDEN_LAYERS + 2   # = 9


def _leaky(t):
    return jnp.where(t > 0, t, NEG_SLOPE * t)


def cdisc_kernel(x_ref, y_ref, wx_ref, wy_ref, wh_ref, ptab_ref, out_ref):
    bm = x_ref.shape[0]
    f32 = jnp.float32

    # one_hot(y) in-kernel: 2-D iota compared against the labels (exact 0/1 in bf16).
    labels = y_ref[...]                                           # (bm, 1) int32
    iota = jax.lax.broadcasted_iota(jnp.int32, (bm, NC_PAD), 1)
    onehot = (iota == labels).astype(jnp.bfloat16)                # (bm, NC_PAD)

    # fc: cat([x, one_hot], 1) @ W_fc + b_fc expressed as two MXU dots (no concat).
    h = jnp.dot(x_ref[...].astype(jnp.bfloat16), wx_ref[...],
                preferred_element_type=f32)
    h = h + jnp.dot(onehot, wy_ref[...], preferred_element_type=f32)
    h = _leaky(h + ptab_ref[0:1, :])

    # Hidden blocks: LReLU(Linear) -> LReLU(BN_eval) -> LReLU(Dropout=id)
    # The two trailing LeakyReLUs compose to a single select with slope 0.04.
    for blk in range(HIDDEN_LAYERS):
        r = 1 + 3 * blk
        b = ptab_ref[r:r + 1, :]
        scale = ptab_ref[r + 1:r + 2, :]
        shift = ptab_ref[r + 2:r + 3, :]
        h = _leaky(jnp.dot(h.astype(jnp.bfloat16), wh_ref[blk],
                           preferred_element_type=f32) + b)
        t = h * scale + shift
        h = jnp.where(t > 0, t, (NEG_SLOPE * NEG_SLOPE) * t)

    # fc_out: hidden -> 1 as a lane reduction (output stays (bm, 1), no activation).
    w_out_row = ptab_ref[PTAB_ROWS - 2:PTAB_ROWS - 1, :]          # (1, HIDDEN_DIM) f32
    b_out = ptab_ref[PTAB_ROWS - 1:PTAB_ROWS, 0:1]                # (1, 1) f32
    out_ref[...] = jnp.sum(h * w_out_row, axis=-1, keepdims=True) + b_out


def init_params(key):
    """PyTorch-style initialization (f32 'master' parameters)."""
    ks = jax.random.split(key, 6)

    def lin(k, fan_in, fan_out):
        bound = 1.0 / jnp.sqrt(fan_in)
        kw, kb = jax.random.split(k)
        w = jax.random.uniform(kw, (fan_in, fan_out), jnp.float32, -bound, bound)
        b = jax.random.uniform(kb, (1, fan_out), jnp.float32, -bound, bound)
        return w, b

    w_fc, b_fc = lin(ks[0], INPUT_DIM + NUM_CLASSES, HIDDEN_DIM)
    w1, b1 = lin(ks[1], HIDDEN_DIM, HIDDEN_DIM)
    w2, b2 = lin(ks[2], HIDDEN_DIM, HIDDEN_DIM)
    w_out, b_out = lin(ks[3], HIDDEN_DIM, 1)

    def bn(k):
        kg, kb, km, kv = jax.random.split(k, 4)
        g = 1.0 + 0.1 * jax.random.normal(kg, (1, HIDDEN_DIM), jnp.float32)
        be = 0.1 * jax.random.normal(kb, (1, HIDDEN_DIM), jnp.float32)
        m = 0.1 * jax.random.normal(km, (1, HIDDEN_DIM), jnp.float32)
        v = 1.0 + 0.1 * jnp.abs(jax.random.normal(kv, (1, HIDDEN_DIM), jnp.float32))
        return g, be, m, v

    g1, be1, m1, v1 = bn(ks[4])
    g2, be2, m2, v2 = bn(ks[5])

    return dict(w_fc=w_fc, b_fc=b_fc,
                w1=w1, b1=b1, g1=g1, be1=be1, m1=m1, v1=v1,
                w2=w2, b2=b2, g2=g2, be2=be2, m2=m2, v2=v2,
                w_out=w_out, b_out=b_out)


def pack_params(p):
    """Fold BN affine, pad the one-hot weight slab, pack small vectors, cast to bf16."""
    # Split fc weight into image part and class(one-hot) part; pad the latter to NC_PAD.
    wx = p["w_fc"][:INPUT_DIM].astype(jnp.bfloat16)                      # (256, 32)
    wy = jnp.zeros((NC_PAD, HIDDEN_DIM), jnp.float32)
    wy = wy.at[:NUM_CLASSES].set(p["w_fc"][INPUT_DIM:]).astype(jnp.bfloat16)
    wh = jnp.stack([p["w1"], p["w2"]], axis=0).astype(jnp.bfloat16)       # (2, 32, 32)

    def bn_affine(g, be, m, v):
        scale = g * jax.lax.rsqrt(v + BN_EPS)
        shift = be - m * scale
        return scale, shift

    s1, sh1 = bn_affine(p["g1"], p["be1"], p["m1"], p["v1"])
    s2, sh2 = bn_affine(p["g2"], p["be2"], p["m2"], p["v2"])

    b_out_row = jnp.zeros((1, HIDDEN_DIM), jnp.float32).at[0, 0].set(p["b_out"][0, 0])
    ptab = jnp.concatenate(
        [p["b_fc"],
         p["b1"], s1, sh1,
         p["b2"], s2, sh2,
         p["w_out"].T,          # (1, HIDDEN_DIM)
         b_out_row],
        axis=0).astype(jnp.float32)                                       # (9, 32)
    return wx, wy, wh, ptab


def cdiscriminator_forward(x, y, packed):
    wx, wy, wh, ptab = packed
    B = x.shape[0]
    x_flat = x.reshape(B, -1).astype(jnp.float32)                         # (B, 256)
    y_col = y.reshape(B, 1).astype(jnp.int32)                             # (B, 1)

    bm = B if B < 128 else 128
    assert B % bm == 0, "batch must be a multiple of the batch block"
    grid = (B // bm,)

    out = pl.pallas_call(
        cdisc_kernel,
        out_shape=jax.ShapeDtypeStruct((B, 1), jnp.float32),
        grid=grid,
        in_specs=[
            pl.BlockSpec((bm, INPUT_DIM), lambda i: (i, 0)),
            pl.BlockSpec((bm, 1), lambda i: (i, 0)),
            pl.BlockSpec((INPUT_DIM, HIDDEN_DIM), lambda i: (0, 0)),
            pl.BlockSpec((NC_PAD, HIDDEN_DIM), lambda i: (0, 0)),
            pl.BlockSpec((HIDDEN_LAYERS, HIDDEN_DIM, HIDDEN_DIM), lambda i: (0, 0, 0)),
            pl.BlockSpec((PTAB_ROWS, HIDDEN_DIM), lambda i: (0, 0)),
        ],
        out_specs=pl.BlockSpec((bm, 1), lambda i: (i, 0)),
        compiler_params=pltpu.CompilerParams(dimension_semantics=("parallel",)),
    )(x_flat, y_col, wx, wy, wh, ptab)
    return out


def reference_forward(x, y, packed):
    """Pure-JAX reference mirroring the kernel's bf16 matmul path."""
    wx, wy, wh, ptab = packed
    B = x.shape[0]
    xf = x.reshape(B, -1)
    onehot = jax.nn.one_hot(y, NC_PAD, dtype=jnp.bfloat16)
    h = jnp.dot(xf.astype(jnp.bfloat16), wx, preferred_element_type=jnp.float32)
    h = h + jnp.dot(onehot, wy, preferred_element_type=jnp.float32)
    h = _leaky(h + ptab[0:1])
    for blk in range(HIDDEN_LAYERS):
        r = 1 + 3 * blk
        h = _leaky(jnp.dot(h.astype(jnp.bfloat16), wh[blk],
                           preferred_element_type=jnp.float32) + ptab[r:r + 1])
        t = h * ptab[r + 1:r + 2] + ptab[r + 2:r + 3]
        h = _leaky(_leaky(t))
    logit = jnp.sum(h * ptab[PTAB_ROWS - 2:PTAB_ROWS - 1], axis=-1, keepdims=True)
    return logit + ptab[PTAB_ROWS - 1, 0]


if __name__ == "__main__":
    key = jax.random.PRNGKey(0)
    kx, ky, kp = jax.random.split(key, 3)
    x = jax.random.normal(kx, (BATCH,) + IMAGE_SHAPE, jnp.float32)       # (8, 1, 16, 16)
    y = jax.random.randint(ky, (BATCH,), 0, NUM_CLASSES, jnp.int32)      # (8,)
    params = init_params(kp)
    packed = pack_params(params)

    out = cdiscriminator_forward(x, y, packed)
    jax.block_until_ready(out)
    assert out.shape == (BATCH, 1), out.shape

    ref = reference_forward(x, y, packed)
    assert jnp.all(jnp.isfinite(out))
    assert jnp.allclose(out, ref, atol=1e-2, rtol=1e-2), (out, ref)

    print("KERNEL_OK")
</pallas_src>

<mosaic_0001>
module attributes {stable_mosaic.version = 11 : i64} {
  func.func @cdisc_kernel(%arg0: i32, %arg1: memref<8x256xf32, #tpu.memory_space<vmem>>, %arg2: memref<8x1xi32, #tpu.memory_space<vmem>>, %arg3: memref<256x32xbf16, #tpu.memory_space<vmem>>, %arg4: memref<16x32xbf16, #tpu.memory_space<vmem>>, %arg5: memref<2x32x32xbf16, #tpu.memory_space<vmem>>, %arg6: memref<9x32xf32, #tpu.memory_space<vmem>>, %arg7: memref<8x1xf32, #tpu.memory_space<vmem>>) attributes {dimension_semantics = [#tpu.dimension_semantics<parallel>], iteration_bounds = array<i64: 1>, scalar_prefetch = 0 : i64, scratch_operands = 0 : i64, tpu.core_type = #tpu.core_type<tc>, window_params = [{transform_indices = @transform_0, window_bounds = array<i64: 8, 256>}, {transform_indices = @transform_1, window_bounds = array<i64: 8, 1>}, {pipeline_mode = #tpu.pipeline_mode<synchronous>, transform_indices = @transform_2, window_bounds = array<i64: 256, 32>}, {pipeline_mode = #tpu.pipeline_mode<synchronous>, transform_indices = @transform_3, window_bounds = array<i64: 16, 32>}, {pipeline_mode = #tpu.pipeline_mode<synchronous>, transform_indices = @transform_4, window_bounds = array<i64: 2, 32, 32>}, {pipeline_mode = #tpu.pipeline_mode<synchronous>, transform_indices = @transform_5, window_bounds = array<i64: 9, 32>}, {transform_indices = @transform_6, window_bounds = array<i64: 8, 1>}]} {
    %c0 = arith.constant 0 : index
    %c0_0 = arith.constant 0 : index
    %0 = vector.load %arg2[%c0, %c0_0] : memref<8x1xi32, #tpu.memory_space<vmem>>, vector<8x1xi32>
    %1 = tpu.iota {dimensions = array<i32: 1>} : vector<8x16xi32>
    %2 = vector.broadcast %0 : vector<8x1xi32> to vector<8x16xi32>
    %3 = arith.cmpi eq, %1, %2 : vector<8x16xi32>
    %4 = arith.extui %3 : vector<8x16xi1> to vector<8x16xi32>
    %5 = arith.sitofp %4 : vector<8x16xi32> to vector<8x16xf32>
    %6 = arith.truncf %5 : vector<8x16xf32> to vector<8x16xbf16>
    %c0_1 = arith.constant 0 : index
    %c0_2 = arith.constant 0 : index
    %7 = vector.load %arg1[%c0_1, %c0_2] : memref<8x256xf32, #tpu.memory_space<vmem>>, vector<8x256xf32>
    %8 = arith.truncf %7 : vector<8x256xf32> to vector<8x256xbf16>
    %c0_3 = arith.constant 0 : index
    %c0_4 = arith.constant 0 : index
    %9 = vector.load %arg3[%c0_3, %c0_4] : memref<256x32xbf16, #tpu.memory_space<vmem>>, vector<256x32xbf16>
    %cst = arith.constant dense<0.000000e+00> : vector<8x32xf32>
    %10 = tpu.matmul %8, %9, %cst {dimension_numbers = #tpu.dot_dimension_numbers<[1], [0], [0], [1], [0, 0, 1, 1], [], []>} : vector<8x256xbf16>, vector<256x32xbf16>, vector<8x32xf32> -> vector<8x32xf32>
    %c0_5 = arith.constant 0 : index
    %c0_6 = arith.constant 0 : index
    %11 = vector.load %arg4[%c0_5, %c0_6] : memref<16x32xbf16, #tpu.memory_space<vmem>>, vector<16x32xbf16>
    %cst_7 = arith.constant dense<0.000000e+00> : vector<8x32xf32>
    %12 = tpu.matmul %6, %11, %cst_7 {dimension_numbers = #tpu.dot_dimension_numbers<[1], [0], [0], [1], [0, 0, 1, 1], [], []>} : vector<8x16xbf16>, vector<16x32xbf16>, vector<8x32xf32> -> vector<8x32xf32>
    %13 = arith.addf %10, %12 : vector<8x32xf32>
    %c0_8 = arith.constant 0 : index
    %c0_9 = arith.constant 0 : index
    %14 = vector.load %arg6[%c0_8, %c0_9] : memref<9x32xf32, #tpu.memory_space<vmem>>, vector<1x32xf32>
    %15 = vector.broadcast %14 : vector<1x32xf32> to vector<8x32xf32>
    %16 = arith.addf %13, %15 : vector<8x32xf32>
    %cst_10 = arith.constant 0.000000e+00 : f32
    %17 = vector.broadcast %cst_10 : f32 to vector<8x32xf32>
    %18 = arith.cmpf ogt, %16, %17 : vector<8x32xf32>
    %cst_11 = arith.constant 2.000000e-01 : f32
    %19 = vector.broadcast %cst_11 : f32 to vector<8x32xf32>
    %20 = arith.mulf %19, %16 : vector<8x32xf32>
    %21 = arith.select %18, %16, %20 : vector<8x32xi1>, vector<8x32xf32>
    %c1 = arith.constant 1 : index
    %c0_12 = arith.constant 0 : index
    %22 = vector.load %arg6[%c1, %c0_12] : memref<9x32xf32, #tpu.memory_space<vmem>>, vector<1x32xf32>
    %c2 = arith.constant 2 : index
    %c0_13 = arith.constant 0 : index
    %23 = vector.load %arg6[%c2, %c0_13] : memref<9x32xf32, #tpu.memory_space<vmem>>, vector<1x32xf32>
    %c3 = arith.constant 3 : index
    %c0_14 = arith.constant 0 : index
    %24 = vector.load %arg6[%c3, %c0_14] : memref<9x32xf32, #tpu.memory_space<vmem>>, vector<1x32xf32>
    %25 = arith.truncf %21 : vector<8x32xf32> to vector<8x32xbf16>
    %c0_15 = arith.constant 0 : index
    %c0_16 = arith.constant 0 : index
    %c0_17 = arith.constant 0 : index
    %26 = vector.load %arg5[%c0_15, %c0_16, %c0_17] : memref<2x32x32xbf16, #tpu.memory_space<vmem>>, vector<1x32x32xbf16>
    %27 = vector.shape_cast %26 : vector<1x32x32xbf16> to vector<32x32xbf16>
    %cst_18 = arith.constant dense<0.000000e+00> : vector<8x32xf32>
    %28 = tpu.matmul %25, %27, %cst_18 {dimension_numbers = #tpu.dot_dimension_numbers<[1], [0], [0], [1], [0, 0, 1, 1], [], []>} : vector<8x32xbf16>, vector<32x32xbf16>, vector<8x32xf32> -> vector<8x32xf32>
    %29 = vector.broadcast %22 : vector<1x32xf32> to vector<8x32xf32>
    %30 = arith.addf %28, %29 : vector<8x32xf32>
    %cst_19 = arith.constant 0.000000e+00 : f32
    %31 = vector.broadcast %cst_19 : f32 to vector<8x32xf32>
    %32 = arith.cmpf ogt, %30, %31 : vector<8x32xf32>
    %cst_20 = arith.constant 2.000000e-01 : f32
    %33 = vector.broadcast %cst_20 : f32 to vector<8x32xf32>
    %34 = arith.mulf %33, %30 : vector<8x32xf32>
    %35 = arith.select %32, %30, %34 : vector<8x32xi1>, vector<8x32xf32>
    %36 = vector.broadcast %23 : vector<1x32xf32> to vector<8x32xf32>
    %37 = arith.mulf %35, %36 : vector<8x32xf32>
    %38 = vector.broadcast %24 : vector<1x32xf32> to vector<8x32xf32>
    %39 = arith.addf %37, %38 : vector<8x32xf32>
    %cst_21 = arith.constant 0.000000e+00 : f32
    %40 = vector.broadcast %cst_21 : f32 to vector<8x32xf32>
    %41 = arith.cmpf ogt, %39, %40 : vector<8x32xf32>
    %cst_22 = arith.constant 4.000000e-02 : f32
    %42 = vector.broadcast %cst_22 : f32 to vector<8x32xf32>
    %43 = arith.mulf %42, %39 : vector<8x32xf32>
    %44 = arith.select %41, %39, %43 : vector<8x32xi1>, vector<8x32xf32>
    %c4 = arith.constant 4 : index
    %c0_23 = arith.constant 0 : index
    %45 = vector.load %arg6[%c4, %c0_23] : memref<9x32xf32, #tpu.memory_space<vmem>>, vector<1x32xf32>
    %c5 = arith.constant 5 : index
    %c0_24 = arith.constant 0 : index
    %46 = vector.load %arg6[%c5, %c0_24] : memref<9x32xf32, #tpu.memory_space<vmem>>, vector<1x32xf32>
    %c6 = arith.constant 6 : index
    %c0_25 = arith.constant 0 : index
    %47 = vector.load %arg6[%c6, %c0_25] : memref<9x32xf32, #tpu.memory_space<vmem>>, vector<1x32xf32>
    %48 = arith.truncf %44 : vector<8x32xf32> to vector<8x32xbf16>
    %c1_26 = arith.constant 1 : index
    %c0_27 = arith.constant 0 : index
    %c0_28 = arith.constant 0 : index
    %49 = vector.load %arg5[%c1_26, %c0_27, %c0_28] : memref<2x32x32xbf16, #tpu.memory_space<vmem>>, vector<1x32x32xbf16>
    %50 = vector.shape_cast %49 : vector<1x32x32xbf16> to vector<32x32xbf16>
    %cst_29 = arith.constant dense<0.000000e+00> : vector<8x32xf32>
    %51 = tpu.matmul %48, %50, %cst_29 {dimension_numbers = #tpu.dot_dimension_numbers<[1], [0], [0], [1], [0, 0, 1, 1], [], []>} : vector<8x32xbf16>, vector<32x32xbf16>, vector<8x32xf32> -> vector<8x32xf32>
    %52 = vector.broadcast %45 : vector<1x32xf32> to vector<8x32xf32>
    %53 = arith.addf %51, %52 : vector<8x32xf32>
    %cst_30 = arith.constant 0.000000e+00 : f32
    %54 = vector.broadcast %cst_30 : f32 to vector<8x32xf32>
    %55 = arith.cmpf ogt, %53, %54 : vector<8x32xf32>
    %cst_31 = arith.constant 2.000000e-01 : f32
    %56 = vector.broadcast %cst_31 : f32 to vector<8x32xf32>
    %57 = arith.mulf %56, %53 : vector<8x32xf32>
    %58 = arith.select %55, %53, %57 : vector<8x32xi1>, vector<8x32xf32>
    %59 = vector.broadcast %46 : vector<1x32xf32> to vector<8x32xf32>
    %60 = arith.mulf %58, %59 : vector<8x32xf32>
    %61 = vector.broadcast %47 : vector<1x32xf32> to vector<8x32xf32>
    %62 = arith.addf %60, %61 : vector<8x32xf32>
    %cst_32 = arith.constant 0.000000e+00 : f32
    %63 = vector.broadcast %cst_32 : f32 to vector<8x32xf32>
    %64 = arith.cmpf ogt, %62, %63 : vector<8x32xf32>
    %cst_33 = arith.constant 4.000000e-02 : f32
    %65 = vector.broadcast %cst_33 : f32 to vector<8x32xf32>
    %66 = arith.mulf %65, %62 : vector<8x32xf32>
    %67 = arith.select %64, %62, %66 : vector<8x32xi1>, vector<8x32xf32>
    %c7 = arith.constant 7 : index
    %c0_34 = arith.constant 0 : index
    %68 = vector.load %arg6[%c7, %c0_34] : memref<9x32xf32, #tpu.memory_space<vmem>>, vector<1x32xf32>
    %c8 = arith.constant 8 : index
    %c0_35 = arith.constant 0 : index
    %69 = vector.load %arg6[%c8, %c0_35] : memref<9x32xf32, #tpu.memory_space<vmem>>, vector<1x1xf32>
    %70 = vector.broadcast %68 : vector<1x32xf32> to vector<8x32xf32>
    %71 = arith.mulf %67, %70 : vector<8x32xf32>
    %cst_36 = arith.constant dense<0.000000e+00> : vector<8xf32>
    %72 = vector.multi_reduction <add>, %71, %cst_36 [1] : vector<8x32xf32> to vector<8xf32>
    %73 = vector.shape_cast %72 : vector<8xf32> to vector<8x1xf32>
    %74 = vector.broadcast %69 : vector<1x1xf32> to vector<8x1xf32>
    %75 = arith.addf %73, %74 : vector<8x1xf32>
    %c0_37 = arith.constant 0 : index
    %c0_38 = arith.constant 0 : index
    %76 = vector.load %arg7[%c0_37, %c0_38] : memref<8x1xf32, #tpu.memory_space<vmem>>, vector<8x1xf32>
    tpu.vector_store %arg7[%c0_37, %c0_38], %75 {strides = array<i32>} : memref<8x1xf32, #tpu.memory_space<vmem>>, vector<8x1xf32>,
    return
  }
  func.func @transform_0(%arg0: i32) -> (i32, i32) {
    %c0_i32 = arith.constant 0 : i32
    %c0_i32_0 = arith.constant 0 : i32
    return %arg0, %c0_i32 : i32, i32
  }
  func.func @transform_1(%arg0: i32) -> (i32, i32) {
    %c0_i32 = arith.constant 0 : i32
    %c0_i32_0 = arith.constant 0 : i32
    return %arg0, %c0_i32 : i32, i32
  }
  func.func @transform_2(%arg0: i32) -> (i32, i32) {
    %c0_i32 = arith.constant 0 : i32
    %c0_i32_0 = arith.constant 0 : i32
    %c0_i32_1 = arith.constant 0 : i32
    return %c0_i32, %c0_i32_0 : i32, i32
  }
  func.func @transform_3(%arg0: i32) -> (i32, i32) {
    %c0_i32 = arith.constant 0 : i32
    %c0_i32_0 = arith.constant 0 : i32
    %c0_i32_1 = arith.constant 0 : i32
    return %c0_i32, %c0_i32_0 : i32, i32
  }
  func.func @transform_4(%arg0: i32) -> (i32, i32, i32) {
    %c0_i32 = arith.constant 0 : i32
    %c0_i32_0 = arith.constant 0 : i32
    %c0_i32_1 = arith.constant 0 : i32
    %c0_i32_2 = arith.constant 0 : i32
    return %c0_i32, %c0_i32_0, %c0_i32_1 : i32, i32, i32
  }
  func.func @transform_5(%arg0: i32) -> (i32, i32) {
    %c0_i32 = arith.constant 0 : i32
    %c0_i32_0 = arith.constant 0 : i32
    %c0_i32_1 = arith.constant 0 : i32
    return %c0_i32, %c0_i32_0 : i32, i32
  }
  func.func @transform_6(%arg0: i32) -> (i32, i32) {
    %c0_i32 = arith.constant 0 : i32
    %c0_i32_0 = arith.constant 0 : i32
    return %arg0, %c0_i32 : i32, i32
  }
}

</mosaic_0001>

<bundles_post_ra>
// kernel: tpu_custom_call.1
= control target key start
LH: loop header
LB: loop body
LE: loop exit
PB: predicated region body
PF: predicated region fallthrough
CT: control target
= control target key end

     0   :  { %v571_v0 = vmov 0   ;;  %v572_v2 = vmov 0.0   ;;  %vm573_vm0 = vmmov 0   ;;  %v25_v24 = vlaneseq  ;;  %s726_s1 = inlined_call_operand.vmem [shape: s32[8,1], index: 1, kind: input, shape index: {}]   ;;  %s727_s2 = inlined_call_operand.vmem [shape: bf16[256,32], index: 2, kind: input, shape index: {}]   ;;  %s728_s0 = inlined_call_operand.vmem [shape: f32[8,256], index: 0, kind: input, shape index: {}]   ;;  %s729_s3 = inlined_call_operand.vmem [shape: bf16[16,32], index: 3, kind: input, shape index: {}]   ;;  %s730_s4 = inlined_call_operand.vmem [shape: bf16[2,32,32], index: 4, kind: input, shape index: {}]   ;;  %s731_s5 = inlined_call_operand.vmem [shape: f32[9,32], index: 5, kind: input, shape index: {}]   ;;  %s732_s6 = inlined_call_operand.vmem [shape: f32[8,1], index: 6, kind: output, shape index: {}]  }
   0x1   :  { %549 = vset.pattern.permute.xlu0 %v571_v0  ;;  %v24_v1 = vld [vmem:[%s726_s1] sm:$0xff]  ;;  %524 = vmatprep.subr.bf16.mxu0 %v572_v2  ;;  %v552_v5 = vld [vmem:[%s727_s2 + $0x48] sm:$0xff]   ;;  %v554_v7 = vld [vmem:[%s727_s2 + $0x50] sm:$0xff]   ;;  %vm78_vm2 = vcmask 130048   ;;  %vm291_vm4 = vcmask 261120   ;;  %vm450_vm9 = vcmask 7168  }
   0x2   :  { %28 = vperm.xlu0 %549, %v24_v1   ;;  %v550_v3 = vld [vmem:[%s727_s2 + $0x40] sm:$0xff]   ;;  %v553_v6 = vld [vmem:[%s727_s2 + $0x8] sm:$0xff]   ;;  %526 = vmatprep.mubr.msk.bf16.mxu0 %vm573_vm0, %v572_v2  ;;  %v555_v8 = vld [vmem:[%s727_s2 + $0x10] sm:$0xff]   ;;  %v26_v25 = vand.u32 127, %v25_v24 }
   0x3   :  { %v551_v4 = vld [vmem:[%s727_s2] sm:$0xff]   ;;  %496 = vmatprep.subr.bf16.mxu1 %v550_v3  ;;  %v556_v9 = vld [vmem:[%s727_s2 + $0x58] sm:$0xff]   ;;  %v560_v13 = vld [vmem:[%s727_s2 + $0x68] sm:$0xff]  }
   0x4   :  { %497 = vmatpush3.bf16.msra.mxu1 %v551_v4  ;;  %v557_v10 = vld [vmem:[%s727_s2 + $0x18] sm:$0xff]   ;;  %v558_v11 = vld [vmem:[%s727_s2 + $0x60] sm:$0xff]   ;;  %v35_v14 = vld [vmem:[%s728_s0 + $0x8] sm:$0xff] }
   0x5   :  { %498 = vmatprep.subr.bf16.mxu1 %v552_v5  ;;  %v559_v12 = vld [vmem:[%s727_s2 + $0x20] sm:$0xff]   ;;  %v37_v15 = vpack.c.bf16 %v35_v14, %v35_v14  ;;  %v561_v17 = vld [vmem:[%s727_s2 + $0x28] sm:$0xff]   ;;  %v562_v18 = vld [vmem:[%s727_s2 + $0x70] sm:$0xff]  }
   0x6   :  { %v566_v16 = vld [vmem:[%s729_s3] sm:$0xff]   ;;  %v563_v19 = vld [vmem:[%s727_s2 + $0x30] sm:$0xff]   ;;  %v564_v20 = vld [vmem:[%s727_s2 + $0x78] sm:$0xff]  }
   0x7   :  { %250 = vmatprep.mubr.bf16.mxu1 %v37_v15  ;;  %525 = vmatpush3.bf16.msra.mxu0 %v566_v16  ;;  %v565_v21 = vld [vmem:[%s727_s2 + $0x38] sm:$0xff]   ;;  %v34_v22 = vld [vmem:[%s728_s0] sm:$0xff]  ;;  %v568_v30 = vld [vmem:[%s730_s4 + $0x8] sm:$0xff]  }
   0x8   :  { %499 = vmatpush3.bf16.msra.mxu1 %v553_v6  ;;  %530 = vmatprep.subr.bf16.mxu0 %v572_v2  ;;  %v36_v23 = vpack.c.bf16 %v34_v22, %v34_v22  ;;  %v567_v29 = vld [vmem:[%s730_s4] sm:$0xff]   ;;  %v569_v46 = vld [vmem:[%s730_s4 + $0x10] sm:$0xff]   ;;  %v570_v47 = vld [vmem:[%s730_s4 + $0x18] sm:$0xff]  }
   0x9   :  { %500 = vmatprep.subr.bf16.mxu1 %v554_v7  ;;  %v475_v37 = vld [vmem:[%s731_s5] ss:$0 sm:$0xff]  ;;  %v476_v48 = vld [vmem:[%s731_s5 + $0x1] ss:$0 sm:$0xff]  ;;  %v480_v53 = vld [vmem:[%s731_s5 + $0x2] ss:$0 sm:$0xff] }
   0xa   :  { %v481_v56 = vld [vmem:[%s731_s5 + $0x3] ss:$0 sm:$0xff]  ;;  %v486_v63 = vld [vmem:[%s731_s5 + $0x4] ss:$0 sm:$0xff]  ;;  %v490_v4 = vld [vmem:[%s731_s5 + $0x5] ss:$0 sm:$0xff] }
   0xb   :  { %v493_v16 = vld [vmem:[%s731_s5 + $0x8] ss:$0 sm:$0xff] }
   0xc   :  { %501 = vmatpush3.bf16.msra.mxu1 %v555_v8  ;;  %v491_v8 = vld [vmem:[%s731_s5 + $0x6] ss:$0 sm:$0xff] }
   0xd   :  { %502 = vmatprep.subr.bf16.mxu1 %v556_v9 }
  0x10   :  { %503 = vmatpush3.bf16.msra.mxu1 %v557_v10 }
  0x11   :  { %504 = vmatprep.subr.bf16.mxu1 %v558_v11 }
  0x14   :  { %505 = vmatpush3.bf16.msra.mxu1 %v559_v12  ;;  %v492_v12 = vld [vmem:[%s731_s5 + $0x7] ss:$0 sm:$0xff] }
  0x15   :  { %506 = vmatprep.subr.bf16.mxu1 %v560_v13 }
  0x18   :  { %507 = vmatpush3.bf16.msra.mxu1 %v561_v17 }
  0x19   :  { %508 = vmatprep.subr.bf16.mxu1 %v562_v18 }
  0x1c   :  { %509 = vmatpush3.bf16.msra.mxu1 %v563_v19 }
  0x1d   :  { %510 = vmatprep.subr.bf16.mxu1 %v564_v20 }
  0x20   :  { %511 = vmatpush3.bf16.msra.mxu1 %v565_v21 }
  0x23   :  { %251 = vmatmul.mubr.bf16.vlgmr.msra.gmra.mrb[0].mxu1 %v36_v23 }
  0x81   :  { %v29_v26 = vpop.permute.xlu0 %28 }
  0x82   :  { %vm30_vm1 = vcmp.eq.s32.totalorder %v26_v25, %v29_v26 }
  0x83   :  { %v456_v27 = vsel %vm30_vm1, 1.0, %v572_v2 }
  0x84   :  { %v33_v28 = vpack.c.bf16 %v456_v27, %v456_v27 }
  0x86   :  { %527 = vmatmul.mubr.msk.bf16.vlgmr.msra.gmra.mrb[0].mxu0 %vm78_vm2, %v33_v28 }
  0x87   :  { %534 = vmatprep.mubr.msk.bf16.mxu0 %vm573_vm0, %v572_v2  ;;  %531 = vmatpush3.bf16.msra.mxu0 %v567_v29 }
  0x88   :  { %532 = vmatprep.subr.bf16.mxu0 %v572_v2 }
  0x8b   :  { %533 = vmatpush3.bf16.msra.mxu0 %v568_v30 }
  0x8c   :  { %538 = vmatprep.subr.bf16.mxu0 %v572_v2 }
  0xf6   :  { %v512_v31 = vpop.f32.mrb[0].mxu1 }
  0xf7   :  { %v513_v32 = vpop.f32.mrb[1].mxu1 }
  0xf8   :  { %v514_v33 = vadd.f32 %v513_v32, %v512_v31  ;;  %v515_v34 = vpop.f32.mrb[2].mxu1 }
  0xf9   :  { %v516_v35 = vpop.f32.mrb[3].mxu1 }
 0x159   :  { %v116_v36 = vpop.f32.mrb[0].mxu0 }
 0x15a   :  { %v253_v38 = vadd.f32 %v514_v33, %v116_v36  ;;  %v528_v39 = vpop.f32.mrb[1].mxu0 }
 0x15b   :  { %v119_v40 = vpop.f32.mrb[2].mxu0 }
 0x15c   :  { %v263_v41 = vadd.f32 %v475_v37, %v253_v38  ;;  %v529_v42 = vpop.f32.mrb[3].mxu0 }
 0x15e   :  { %vm264_vm3 = vcmp.gt.f32.partialorder %v263_v41, 0.0  ;;  %v265_v43 = vmul.f32 0.2, %v263_v41 }
 0x160   :  { %v266_v44 = vsel %vm264_vm3, %v263_v41, %v265_v43 }
 0x161   :  { %v270_v45 = vpack.c.bf16 %v266_v44, %v266_v44 }
 0x163   :  { %535 = vmatmul.mubr.msk.bf16.vlgmr.msra.gmra.mrb[4].mxu0 %vm291_vm4, %v270_v45 }
 0x164   :  { %542 = vmatprep.mubr.msk.bf16.mxu0 %vm573_vm0, %v572_v2  ;;  %539 = vmatpush3.bf16.msra.mxu0 %v569_v46 }
 0x165   :  { %540 = vmatprep.subr.bf16.mxu0 %v572_v2 }
 0x168   :  { %541 = vmatpush3.bf16.msra.mxu0 %v570_v47 }
 0x236   :  { %v329_v49 = vpop.f32.mrb[4].mxu0 }
 0x237   :  { %v330_v50 = vadd.f32 %v476_v48, %v329_v49  ;;  %v536_v51 = vpop.f32.mrb[5].mxu0 }
 0x238   :  { %v332_v52 = vpop.f32.mrb[6].mxu0 }
 0x239   :  { %vm335_vm5 = vcmp.gt.f32.partialorder %v330_v50, 0.0  ;;  %v336_v54 = vmul.f32 0.2, %v330_v50  ;;  %v537_v55 = vpop.f32.mrb[7].mxu0 }
 0x23b   :  { %v337_v57 = vsel %vm335_vm5, %v330_v50, %v336_v54 }
 0x23c   :  { %v342_v58 = vmul.f32 %v480_v53, %v337_v57 }
 0x23e   :  { %v347_v59 = vadd.f32 %v481_v56, %v342_v58 }
 0x240   :  { %vm348_vm6 = vcmp.gt.f32.partialorder %v347_v59, 0.0  ;;  %v349_v60 = vmul.f32 0.04, %v347_v59 }
 0x242   :  { %v350_v61 = vsel %vm348_vm6, %v347_v59, %v349_v60 }
 0x243   :  { %v354_v62 = vpack.c.bf16 %v350_v61, %v350_v61 }
 0x245   :  { %543 = vmatmul.mubr.msk.bf16.vlgmr.msra.gmra.mrb[8].mxu0 %vm291_vm4, %v354_v62 }
 0x318   :  { %v413_v0 = vpop.f32.mrb[8].mxu0 }
 0x319   :  { %v414_v1 = vadd.f32 %v486_v63, %v413_v0  ;;  %v544_v2 = vpop.f32.mrb[9].mxu0 }
 0x31a   :  { %v416_v3 = vpop.f32.mrb[10].mxu0 }
 0x31b   :  { %vm419_vm7 = vcmp.gt.f32.partialorder %v414_v1, 0.0  ;;  %v420_v5 = vmul.f32 0.2, %v414_v1  ;;  %v545_v6 = vpop.f32.mrb[11].mxu0 }
 0x31d   :  { %v421_v7 = vsel %vm419_vm7, %v414_v1, %v420_v5 }
 0x31e   :  { %v426_v9 = vmul.f32 %v490_v4, %v421_v7 }
 0x320   :  { %v431_v10 = vadd.f32 %v491_v8, %v426_v9 }
 0x322   :  { %vm432_vm8 = vcmp.gt.f32.partialorder %v431_v10, 0.0  ;;  %v433_v11 = vmul.f32 0.04, %v431_v10 }
 0x324   :  { %v434_v13 = vsel %vm432_vm8, %v431_v10, %v433_v11 }
 0x325   :  { %v441_v14 = vmul.f32 %v492_v12, %v434_v13 }
 0x327   :  { %v442_v15 = vsel %vm291_vm4, %v441_v14, 0.0 }
 0x328   :  { %443 = vadd.xlane.f32.xlu0 %v442_v15 }
 0x3b5   :  { %v444_v17 = vpop.xlane.xlu0 %443 }
 0x3b6   :  { %v449_v18 = vadd.f32 %v493_v16, %v444_v17 }
 0x3b8   :  { %451 = vst.msk [vmem:[%s732_s6] sm:$0xff] %vm450_vm9, %v449_v18 }

</bundles_post_ra>
